<compile_context>
chip_gen: v6e
topology: v6e:2x2x1
jax: 0.10.0
libtpu: 0.0.40
codegen_flags: <defaults>
</compile_context>

<pallas_src>
import math

import jax
import jax.numpy as jnp
from jax.experimental import pallas as pl
from jax.experimental.pallas import tpu as pltpu


def _round_up(x, m):
    return (x + m - 1) // m * m


def _pad_to(a, shape):
    pads = [(0, t - s) for s, t in zip(a.shape, shape)]
    if any(hi for _, hi in pads):
        a = jnp.pad(a, pads)
    return a


def _siren_kernel(x_ref, w_ref, b_ref, o_ref):
    # x_ref: (TM, K) bf16, w_ref: (K, TN) bf16, b_ref: (1, TN) f32, o_ref: (TM, TN) f32
    acc = jnp.dot(x_ref[...], w_ref[...], preferred_element_type=jnp.float32)
    acc = acc + b_ref[...]                       # bias broadcast over batch rows (f32)
    o_ref[...] = jnp.sin(acc).astype(o_ref.dtype)  # Sine(w0): w0 already folded into W,b
    # dropout(p=0.0) is identity


def prepare_siren_params(weight, bias, *, w0=1.0):
    """One-time parameter prep (call once at init, NOT per forward).

    weight: (dim_out, dim_in) PyTorch layout, bias: (dim_out,).
    Folds w0 into the params, transposes W to (dim_in, dim_out), zero-pads to
    multiples of 128 and casts W to bf16 for the MXU (bias stays f32).
    """
    dim_out, dim_in = weight.shape
    k_pad = _round_up(dim_in, 128)
    n_pad = _round_up(dim_out, 128)
    w = _pad_to((w0 * weight).T, (k_pad, n_pad)).astype(jnp.bfloat16)
    b = _pad_to((w0 * bias).reshape(1, dim_out).astype(jnp.float32), (1, n_pad))
    return w, b


def siren_forward(x, w_prepped, b_prepped, dim_out):
    """x: (B, dim_in) f32; w_prepped/b_prepped from prepare_siren_params."""
    B, dim_in = x.shape
    k_pad, n_pad = w_prepped.shape

    # Lane-dense N tiles (256-multiples feed the full 256x256 MXU on v6e/v7x,
    # 128 still saturates v5e); bounded M tiles (easily fits v7x's 64 MiB VMEM).
    tn = 256 if n_pad % 256 == 0 else 128
    tm = min(512, _round_up(B, 8))
    b_rows = _round_up(B, tm)

    xp = _pad_to(x, (b_rows, k_pad)).astype(jnp.bfloat16)

    grid_n = n_pad // tn
    grid_m = b_rows // tm

    out = pl.pallas_call(
        _siren_kernel,
        out_shape=jax.ShapeDtypeStruct((b_rows, n_pad), jnp.float32),
        # Batch axis innermost -> the weight/bias tiles keep the same block index
        # across the inner loop and are only DMA'd once per output-column tile.
        grid=(grid_n, grid_m),
        in_specs=[
            pl.BlockSpec((tm, k_pad), lambda j, i: (i, 0)),
            pl.BlockSpec((k_pad, tn), lambda j, i: (0, j)),
            pl.BlockSpec((1, tn), lambda j, i: (0, j)),
        ],
        out_specs=pl.BlockSpec((tm, tn), lambda j, i: (i, j)),
        compiler_params=pltpu.CompilerParams(
            dimension_semantics=("parallel", "parallel"),
            vmem_limit_bytes=32 * 1024 * 1024,
        ),
        cost_estimate=pl.CostEstimate(
            flops=2 * b_rows * k_pad * n_pad,
            transcendentals=b_rows * n_pad,
            bytes_accessed=2 * b_rows * k_pad + 2 * k_pad * n_pad
                           + 4 * n_pad + 4 * b_rows * n_pad,
        ),
    )(xp, w_prepped, b_prepped)

    # TODO(synk): for very large dim_in add a K grid axis + VMEM f32 accumulator,
    # and fuse consecutive Siren layers into one pallas_call so activations stay
    # VMEM-resident across the network.
    return out[:B, :dim_out]


def init_siren_params(key, dim_in, dim_out, *, w0=1.0, c=6.0, is_first=False):
    # Matches Siren.init_: uniform(-w_std, w_std)
    w_std = (1.0 / dim_in) if is_first else (math.sqrt(c / dim_in) / w0)
    kw, kb = jax.random.split(key)
    weight = jax.random.uniform(kw, (dim_out, dim_in), jnp.float32,
                                minval=-w_std, maxval=w_std)
    bias = jax.random.uniform(kb, (dim_out,), jnp.float32,
                              minval=-w_std, maxval=w_std)
    return weight, bias


if __name__ == "__main__":
    key = jax.random.PRNGKey(0)
    k1, k2, k3, k4 = jax.random.split(key, 4)

    def bf16_ref(x, weight, bias, w0):
        # Reference applying the same bf16 input rounding the kernel uses.
        xb = x.astype(jnp.bfloat16).astype(jnp.float32)
        wb = (w0 * weight).astype(jnp.bfloat16).astype(jnp.float32)
        return jnp.sin(xb @ wb.T + w0 * bias)

    # --- test 1: small demo shapes (single tile) ---
    batch, dim_in, dim_out, w0 = 8, 16, 32, 1.0
    x = jax.random.normal(k1, (batch, dim_in), jnp.float32)
    weight, bias = init_siren_params(k2, dim_in, dim_out, w0=w0, c=6.0, is_first=False)
    w_p, b_p = prepare_siren_params(weight, bias, w0=w0)
    out = jax.block_until_ready(siren_forward(x, w_p, b_p, dim_out))
    assert out.shape == (batch, dim_out)
    # tight check vs bf16-matched reference, loose sanity vs full-f32 reference
    assert jnp.allclose(out, bf16_ref(x, weight, bias, w0), atol=2e-3, rtol=2e-3)
    ref_exact = jnp.sin(w0 * (x @ weight.T + bias))
    assert jnp.allclose(out, ref_exact, atol=1e-1, rtol=1e-1)

    # --- test 2: multi-tile grid (padding + weight-tile reuse), w0 != 1 ---
    batch, dim_in, dim_out, w0 = 520, 48, 300, 30.0
    x = jax.random.normal(k3, (batch, dim_in), jnp.float32)
    weight, bias = init_siren_params(k4, dim_in, dim_out, w0=w0, c=6.0, is_first=True)
    w_p, b_p = prepare_siren_params(weight, bias, w0=w0)
    out = jax.block_until_ready(siren_forward(x, w_p, b_p, dim_out))
    assert out.shape == (batch, dim_out)
    assert jnp.allclose(out, bf16_ref(x, weight, bias, w0), atol=2e-3, rtol=2e-3)

    print("KERNEL_OK")
</pallas_src>

<mosaic_0001>
module attributes {stable_mosaic.version = 11 : i64} {
  func.func @_siren_kernel(%arg0: i32, %arg1: i32, %arg2: memref<8x128xbf16, #tpu.memory_space<vmem>>, %arg3: memref<128x128xbf16, #tpu.memory_space<vmem>>, %arg4: memref<1x128xf32, #tpu.memory_space<vmem>>, %arg5: memref<8x128xf32, #tpu.memory_space<vmem>>) attributes {dimension_semantics = [#tpu.dimension_semantics<parallel>, #tpu.dimension_semantics<parallel>], iteration_bounds = array<i64: 1, 1>, scalar_prefetch = 0 : i64, scratch_operands = 0 : i64, tpu.core_type = #tpu.core_type<tc>, window_params = [{transform_indices = @transform_0, window_bounds = array<i64: 8, 128>}, {transform_indices = @transform_1, window_bounds = array<i64: 128, 128>}, {transform_indices = @transform_2, window_bounds = array<i64: 1, 128>}, {transform_indices = @transform_3, window_bounds = array<i64: 8, 128>}]} {
    %c0 = arith.constant 0 : index
    %c0_0 = arith.constant 0 : index
    %0 = vector.load %arg2[%c0, %c0_0] : memref<8x128xbf16, #tpu.memory_space<vmem>>, vector<8x128xbf16>
    %c0_1 = arith.constant 0 : index
    %c0_2 = arith.constant 0 : index
    %1 = vector.load %arg3[%c0_1, %c0_2] : memref<128x128xbf16, #tpu.memory_space<vmem>>, vector<128x128xbf16>
    %cst = arith.constant dense<0.000000e+00> : vector<8x128xf32>
    %2 = tpu.matmul %0, %1, %cst {dimension_numbers = #tpu.dot_dimension_numbers<[1], [0], [0], [1], [0, 0, 1, 1], [], []>} : vector<8x128xbf16>, vector<128x128xbf16>, vector<8x128xf32> -> vector<8x128xf32>
    %c0_3 = arith.constant 0 : index
    %c0_4 = arith.constant 0 : index
    %3 = vector.load %arg4[%c0_3, %c0_4] : memref<1x128xf32, #tpu.memory_space<vmem>>, vector<1x128xf32>
    %4 = vector.broadcast %3 : vector<1x128xf32> to vector<8x128xf32>
    %5 = arith.addf %2, %4 : vector<8x128xf32>
    %6 = math.sin %5 : vector<8x128xf32>
    %c0_5 = arith.constant 0 : index
    %c0_6 = arith.constant 0 : index
    %7 = vector.load %arg5[%c0_5, %c0_6] : memref<8x128xf32, #tpu.memory_space<vmem>>, vector<8x128xf32>
    tpu.vector_store %arg5[%c0_5, %c0_6], %6 {strides = array<i32>} : memref<8x128xf32, #tpu.memory_space<vmem>>, vector<8x128xf32>,
    return
  }
  func.func @transform_0(%arg0: i32, %arg1: i32) -> (i32, i32) {
    %c0_i32 = arith.constant 0 : i32
    %c0_i32_0 = arith.constant 0 : i32
    return %arg1, %c0_i32 : i32, i32
  }
  func.func @transform_1(%arg0: i32, %arg1: i32) -> (i32, i32) {
    %c0_i32 = arith.constant 0 : i32
    %c0_i32_0 = arith.constant 0 : i32
    return %c0_i32, %arg0 : i32, i32
  }
  func.func @transform_2(%arg0: i32, %arg1: i32) -> (i32, i32) {
    %c0_i32 = arith.constant 0 : i32
    %c0_i32_0 = arith.constant 0 : i32
    return %c0_i32, %arg0 : i32, i32
  }
  func.func @transform_3(%arg0: i32, %arg1: i32) -> (i32, i32) {
    %c0_i32 = arith.constant 0 : i32
    return %arg1, %arg0 : i32, i32
  }
}

</mosaic_0001>

<bundles_post_ra>
// kernel: tpu_custom_call.1
= control target key start
LH: loop header
LB: loop body
LE: loop exit
PB: predicated region body
PF: predicated region fallthrough
CT: control target
= control target key end

     0   :  { %8 = vsyncpa [#allocation3], 0  ;;  %s478_s0 = inlined_call_operand.hbm [shape: bf16[8,128], index: 0, kind: input, shape index: {}]   ;;  %s479_s1 = inlined_call_operand.hbm [shape: bf16[128,128], index: 1, kind: input, shape index: {}]   ;;  %s480_s2 = inlined_call_operand.vmem [shape: f32[1,128], index: 2, kind: input, shape index: {}]   ;;  %s481_s3 = inlined_call_operand.hbm [shape: f32[8,128], index: 3, kind: output, shape index: {}]  }
   0x1   :  { %9 = vsyncpa [#allocation6], 0 }
   0x2   :  { %10 = vsyncpa [#allocation4], 0  ;;  %s412_s12 = smov [#allocation2]   ;;  %s413_s14 = smov [#allocation5]  }
   0x3   :  { %s17_s13 = sshll.u32 %s412_s12, 4  ;;  %s26_s15 = sshll.u32 %s413_s14, 4  ;;  %s18_s13 = int_to_ptr.vmem [resolvable:$true] %s17_s13  ;;  %s27_s15 = int_to_ptr.vmem [resolvable:$true] %s26_s15 }
   0x4   :  { %s354_s16 = scalar_lea.vmem %s18_s13, 64  ;;  %p359_p1 = scmp.lt.s32.totalorder %s18_s13, %s18_s13 }
   0x5   :  { %p355_p0 = scmp.ne.s32.totalorder %s18_s13, %s354_s16  ;;  %p360_p2 = scmp.lt.s32.totalorder %s354_s16, %s354_s16 }
   0x7   :  { %p361_p3 = por %p360_p2, %p359_p1 }
   0x9   :  { %p362_p4 = pnand %p361_p3, %p355_p0 }
   0xb   :  { %365 = shalt.err (!%p362_p4)
}
   0xc   :  { %20 = dma.hbm_to_vmem [thread:$0]  %s478_s0, 64, %s18_s13, [#allocation3]  }
   0xd   :  { %s374_s19 = scalar_lea.vmem %s27_s15, 1024  ;;  %p379_p6 = scmp.lt.s32.totalorder %s27_s15, %s27_s15 }
   0xe   :  { %p375_p5 = scmp.ne.s32.totalorder %s27_s15, %s374_s19  ;;  %p380_p7 = scmp.lt.s32.totalorder %s374_s19, %s374_s19 }
  0x10   :  { %p381_p8 = por %p380_p7, %p379_p6 }
  0x12   :  { %p382_p9 = pnand %p381_p8, %p375_p5 }
  0x14   :  { %385 = shalt.err (!%p382_p9)
}
  0x15   :  { %s414_s20 = smov 64   ;;  %s415_s21 = smov 4  }
  0x16   :  { %32 = dma.hbm_to_vmem [thread:$0]  %s479_s1, 1024, %s27_s15, [#allocation6], %s414_s20, %s414_s20, %s415_s21  }
  0x17   :  { %406 = dma.done.wait [#allocation3], 64  }
  0x18   :  { %407 = vsyncadd [#allocation3], 4294967232 }
  0x19   :  { %408 = dma.done.wait [#allocation6], 1024  }
  0x1a   :  { %409 = vsyncadd [#allocation6], 4294966272  ;;  %v416_v0 = vmov 0.0   ;;  %vm417_vm0 = vmmov 0   ;;  %v334_v1 = vld [vmem:[#allocation5 + $0x38] sm:$0xff]   ;;  %v335_v2 = vld [vmem:[#allocation5 + $0x30] sm:$0xff]  }
  0x1b   :  { %297 = vmatprep.subr.bf16.mxu0 %v416_v0  ;;  %313 = vmatprep.mubr.msk.bf16.mxu0 %vm417_vm0, %v416_v0  ;;  %v336_v3 = vld [vmem:[#allocation5 + $0x28] sm:$0xff]   ;;  %v337_v4 = vld [vmem:[#allocation5 + $0x20] sm:$0xff]   ;;  %v338_v5 = vld [vmem:[#allocation5 + $0x18] sm:$0xff]   ;;  %v418_v26 = vmov 683565275  }
  0x1c   :  { %298 = vmatpush3.bf16.msra.mxu0 %v334_v1  ;;  %v339_v6 = vld [vmem:[#allocation5 + $0x10] sm:$0xff]   ;;  %v340_v7 = vld [vmem:[#allocation5 + $0x8] sm:$0xff]   ;;  %v341_v8 = vld [vmem:[#allocation5] sm:$0xff]   ;;  %v419_v28 = vmov 2475754826  }
  0x1d   :  { %299 = vmatprep.subr.bf16.mxu0 %v416_v0  ;;  %v42_v9 = vld [vmem:[#allocation2] sm:$0xf]  ;;  %v420_v31 = vmov 2131351028   ;;  %v421_v34 = vmov 2102212464  }
  0x1e   :  { %v275_v10 = vld [vmem:[%s480_s2] ss:$0 sm:$0xff]  ;;  %v422_v37 = vmov 920167782   ;;  %v423_v40 = vmov 1326507024  }
  0x1f   :  { %s424_s2 = smov [#allocation7]  }
  0x20   :  { %300 = vmatpush3.bf16.msra.mxu0 %v335_v2  ;;  %s265_s24 = sshll.u32 %s424_s2, 4  ;;  %s266_s24 = int_to_ptr.vmem [resolvable:$true] %s265_s24 }
  0x21   :  { %301 = vmatprep.subr.bf16.mxu0 %v416_v0  ;;  %s386_s25 = scalar_lea.vmem %s266_s24, 128  ;;  %p391_p11 = scmp.lt.s32.totalorder %s266_s24, %s266_s24 }
  0x22   :  { %p387_p10 = scmp.ne.s32.totalorder %s266_s24, %s386_s25  ;;  %p392_p12 = scmp.lt.s32.totalorder %s386_s25, %s386_s25 }
  0x24   :  { %302 = vmatpush3.bf16.msra.mxu0 %v336_v3  ;;  %p393_p13 = por %p392_p12, %p391_p11 }
  0x25   :  { %303 = vmatprep.subr.bf16.mxu0 %v416_v0 }
  0x26   :  { %p394_p0 = pnand %p393_p13, %p387_p10 }
  0x28   :  { %304 = vmatpush3.bf16.msra.mxu0 %v337_v4 }
  0x29   :  { %305 = vmatprep.subr.bf16.mxu0 %v416_v0 }
  0x2c   :  { %306 = vmatpush3.bf16.msra.mxu0 %v338_v5 }
  0x2d   :  { %307 = vmatprep.subr.bf16.mxu0 %v416_v0 }
  0x30   :  { %308 = vmatpush3.bf16.msra.mxu0 %v339_v6 }
  0x31   :  { %309 = vmatprep.subr.bf16.mxu0 %v416_v0 }
  0x34   :  { %310 = vmatpush3.bf16.msra.mxu0 %v340_v7 }
  0x35   :  { %311 = vmatprep.subr.bf16.mxu0 %v416_v0 }
  0x38   :  { %312 = vmatpush3.bf16.msra.mxu0 %v341_v8 }
  0x3b   :  { %314 = vmatmul.mubr.bf16.vlgmr.msra.gmra.mxu0 %v42_v9 }
  0xfb   :  { %v148_v11 = vpop.f32.mrf.mxu0 }
  0xfc   :  { %v454_v12 = vadd.f32 %v275_v10, %v148_v11 }
  0xfd   :  { %v315_v13 = vpop.f32.mrf.mxu0 }
  0xfe   :  { %v157_v14 = vand.u32 2139095040, %v454_v12  ;;  %v154_v20 = vand.u32 2147483647, %v454_v12  ;;  %vm156_vm8 = vcmp.lt.s32.totalorder %v454_v12, 0  ;;  %vm246_vm13 = vweird.f32 %v454_v12 }
  0xff   :  { %v151_v15 = vpop.f32.mrf.mxu0 }
 0x100   :  { %v158_v16 = vshrl.u32 %v157_v14, 23  ;;  %v161_v23 = vand.u32 8388607, %v154_v20  ;;  %vm155_vm9 = vcmp.le.f32.partialorder %v154_v20, 0.7853982 }
 0x101   :  { %v316_v17 = vpop.f32.mrf.mxu0 }
 0x102   :  { %v284_v18 = vadd.s32 4294967169, %v158_v16  ;;  %v162_v42 = vor.u32 8388608, %v161_v23 }
 0x104   :  { %v164_v19 = vadd.s32 1, %v284_v18  ;;  %v202_v56 = vshll.u32 %v162_v42, 8 }
 0x106   :  { %vm165_vm1 = vcmp.gt.s32.totalorder %v164_v19, 0 }
 0x107   :  { %v166_v21 = vsel %vm165_vm1, %v164_v19, 0 }
 0x108   :  { %v168_v22 = vand.u32 31, %v166_v21  ;;  %v167_v25 = vshrl.u32 %v166_v21, 5 }
 0x10a   :  { %v169_v24 = vsub.s32 32, %v168_v22  ;;  %v171_v27 = vshll.u32 %v418_v26, %v168_v22  ;;  %v174_v29 = vshll.u32 %v419_v28, %v168_v22  ;;  %v177_v33 = vshll.u32 %v420_v31, %v168_v22 }
 0x10b   :  { %v180_v36 = vshll.u32 %v421_v34, %v168_v22  ;;  %v183_v39 = vshll.u32 %v422_v37, %v168_v22  ;;  %vm186_vm2 = vcmp.lt.s32.totalorder %v167_v25, 1  ;;  %vm189_vm3 = vcmp.lt.s32.totalorder %v167_v25, 4 }
 0x10c   :  { %v172_v30 = vshrl.u32 %v419_v28, %v169_v24  ;;  %v175_v32 = vshrl.u32 %v420_v31, %v169_v24  ;;  %v178_v35 = vshrl.u32 %v421_v34, %v169_v24  ;;  %v181_v38 = vshrl.u32 %v422_v37, %v169_v24 }
 0x10d   :  { %v184_v41 = vshrl.u32 %v423_v40, %v169_v24  ;;  %v170_v51 = vshrl.u32 %v418_v26, %v169_v24  ;;  %vm188_vm4 = vcmp.lt.s32.totalorder %v167_v25, 3  ;;  %vm187_vm5 = vcmp.lt.s32.totalorder %v167_v25, 2 }
 0x10e   :  { %v173_v43 = vor.u32 %v172_v30, %v171_v27  ;;  %v176_v44 = vor.u32 %v175_v32, %v174_v29  ;;  %v179_v45 = vor.u32 %v178_v35, %v177_v33  ;;  %v182_v46 = vor.u32 %v181_v38, %v180_v36 }
 0x10f   :  { %v185_v47 = vor.u32 %v184_v41, %v183_v39 }
 0x110   :  { %v191_v48 = vsel %vm189_vm3, %v179_v45, 2102212464  ;;  %v194_v49 = vsel %vm186_vm2, %v173_v43, %v176_v44  ;;  %v198_v50 = vsel %vm186_vm2, %v176_v44, %v179_v45  ;;  %v195_v52 = vsel %vm189_vm3, %v182_v46, 920167782 }
 0x111   :  { %v199_v53 = vsel %vm189_vm3, %v185_v47, 1326507024  ;;  %v196_v54 = vsel %vm188_vm4, %v179_v45, %v195_v52  ;;  %v190_v57 = vsel %vm186_vm2, %v170_v51, %v173_v43  ;;  %v192_v58 = vsel %vm188_vm4, %v176_v44, %v191_v48 }
 0x112   :  { %v200_v55 = vsel %vm188_vm4, %v182_v46, %v199_v53  ;;  %v197_v59 = vsel %vm187_vm5, %v194_v49, %v196_v54  ;;  %v193_v1 = vsel %vm187_vm5, %v190_v57, %v192_v58 }
 0x113   :  { %v201_v60 = vsel %vm187_vm5, %v198_v50, %v200_v55  ;;  %v463_v63 = vmul.u32.u64.low %v202_v56, %v197_v59  ;;  %v464_v0 = vmul.u32.u64.high %v202_v56, %v197_v59, %v463_v63  ;;  %v209_v3 = vmul.u32 %v202_v56, %v193_v1 }
 0x114   :  { %v460_v61 = vmul.u32.u64.low %v202_v56, %v201_v60  ;;  %v461_v62 = vmul.u32.u64.high %v202_v56, %v201_v60, %v460_v61 }
 0x115   :  { %v212_v2 = vadd.s32 1, %v464_v0 }
 0x116   :  { %vm211_vm6 = vc.u32 %v461_v62, %v463_v63  ;;  %v210_v16 = vadd.s32 %v463_v63, %v461_v62 }
 0x117   :  { %v213_v4 = vsel %vm211_vm6, %v212_v2, %v464_v0 }
 0x118   :  { %v214_v5 = vadd.s32 %v213_v4, %v209_v3 }
 0x11a   :  { %v215_v6 = vadd.s32 536870912, %v214_v5 }
 0x11c   :  { %v216_v7 = vshrl.u32 %v215_v6, 30 }
 0x11e   :  { %v217_v8 = vshll.u32 %v216_v7, 30  ;;  %v240_v30 = vsub.s32 4, %v216_v7 }
 0x120   :  { %v218_v9 = vsub.s32 %v214_v5, %v217_v8  ;;  %v241_v33 = vsel %vm156_vm8, %v240_v30, %v216_v7 }
 0x121   :  { %v243_v34 = vsel %vm155_vm9, 0, %v241_v33 }
 0x122   :  { %v220_v10 = vsub.s32 0, %v218_v9  ;;  %v247_v35 = vadd.s32 3, %v243_v34 }
 0x124   :  { %v285_v11 = vmin.u32 %v220_v10, %v218_v9  ;;  %v248_v36 = vand.u32 3, %v247_v35 }
 0x126   :  { %v222_v13 = vclz %v285_v11  ;;  %vm253_vm10 = vcmp.eq.s32.totalorder %v248_v36, 2  ;;  %vm250_vm11 = vcmp.eq.s32.totalorder %v248_v36, 0  ;;  %vm249_vm12 = vcmp.lt.s32.totalorder %v248_v36, 2 }
 0x128   :  { %v286_v14 = vadd.s32 4294967294, %v222_v13 }
 0x12a   :  { %vm287_vm7 = vcmp.lt.s32.totalorder %v286_v14, 0 }
 0x12b   :  { %v225_v15 = vsel %vm287_vm7, 0, %v286_v14 }
 0x12c   :  { %v226_v17 = vsub.s32 32, %v225_v15  ;;  %v230_v18 = vsub.s32 4294967266, %v225_v15  ;;  %v227_v19 = vshll.u32 %v218_v9, %v225_v15 }
 0x12e   :  { %v228_v21 = vshrl.u32 %v210_v16, %v226_v17  ;;  %v231_v22 = vadd.s32 127, %v230_v18 }
 0x130   :  { %v229_v23 = vor.u32 %v228_v21, %v227_v19  ;;  %v232_v24 = vshll.u32 %v231_v22, 23 }
 0x132   :  { %v233_v25 = vor.u32 4788187, %v232_v24  ;;  %v236_v27 = vcvt.s32.f32 %v229_v23 }
 0x134   :  { %v234_v26 = vand.u32 2147483647, %v233_v25 }
 0x136   :  { %v237_v28 = vmul.f32 %v236_v27, %v234_v26 }
 0x138   :  { %v238_v29 = vxor.u32 2147483648, %v237_v28 }
 0x13a   :  { %v239_v31 = vsel %vm156_vm8, %v238_v29, %v237_v28 }
 0x13b   :  { %v242_v32 = vsel %vm155_vm9, %v454_v12, %v239_v31 }
 0x13c   :  { %342 = vcosq.f32 %v242_v32 }
 0x13d   :  { %344 = vsinq.f32 %v242_v32 }
 0x149   :  { %v343_v37 = vpop.eup %342 }
 0x14a   :  { %v345_v38 = vpop.eup %344  ;;  %v254_v39 = vxor.u32 2147483648, %v343_v37 }
 0x14b   :  { %v251_v40 = vxor.u32 2147483648, %v345_v38 }
 0x14c   :  { %v255_v41 = vsel %vm253_vm10, %v254_v39, %v345_v38 }
 0x14d   :  { %v252_v42 = vsel %vm250_vm11, %v343_v37, %v251_v40 }
 0x14e   :  { %v256_v20 = vsel %vm249_vm12, %v252_v42, %v255_v41 }
 0x14f   :  { %v257_v43 = vsel %vm246_vm13, nan, %v256_v20 }
 0x150   :  { %258 = vst [vmem:[#allocation7] sm:$0xff] %v257_v43 }
 0x151   :  { %397 = shalt.err (!%p394_p0)
}
 0x152   :  { %268 = dma.vmem_to_hbm [thread:$0]  %s266_s24, 128, %s481_s3, [#allocation4]  }
 0x153   :  { %410 = dma.done.wait [#allocation4], 128  }
 0x154   :  { %411 = vsyncadd [#allocation4], 4294967168 }
 0x155   :  { %272 = vsyncpa [#allocation3], 1 }
 0x156   :  { %273 = vsyncpa [#allocation6], 1 }
 0x157   :  { %274 = vsyncpa [#allocation4], 1 }

</bundles_post_ra>
